<compile_context>
chip_gen: v6e
topology: v6e:2x2x1
jax: 0.10.0
libtpu: 0.0.40
codegen_flags: <defaults>
</compile_context>

<pallas_src>
import functools

import jax
import jax.numpy as jnp
from jax.experimental import pallas as pl
from jax.experimental.pallas import tpu as pltpu


# ---------------------------------------------------------------------------------------------
# small helpers
# ---------------------------------------------------------------------------------------------

def _round_up(x, m):
    return ((x + m - 1) // m) * m


def _const_map(ndim):
    """Constant index_map: the block stays resident in VMEM across all grid steps."""
    return lambda *_: (0,) * ndim


def _padded_bytes(shape, itemsize):
    """Rough VMEM footprint of one buffer, accounting for (8, 128) tile padding."""
    if len(shape) == 0:
        return itemsize
    if len(shape) == 1:
        return _round_up(shape[0], 128) * itemsize
    lead = 1
    for d in shape[:-2]:
        lead *= int(d)
    return lead * _round_up(shape[-2], 8) * _round_up(shape[-1], 128) * itemsize


def _choose_batch_tile(B, N, F, nout, itemsize, resident_bytes, vmem_limit_bytes, max_tile=8):
    """Largest divisor of B (capped for static-unroll sanity) whose per-step blocks fit ~half of
    the VMEM limit after the resident weights / adjacency are accounted for."""
    per_b = (2 * _padded_bytes((1, N, F), itemsize)          # x block, double-buffered
             + 2 * _padded_bytes((1, N, nout), itemsize)     # y block, double-buffered
             + 2 * _padded_bytes((1, N, 1), 4)               # BN partial-sum blocks
             + 4 * _padded_bytes((N, max(F, nout)), 4))      # f32 in-register working set (rough)
    budget = max(int(vmem_limit_bytes) // 2 - int(resident_bytes), per_b)
    bt = max(1, min(B, max_tile, budget // per_b))
    while B % bt:
        bt -= 1
    return int(bt)


# ---------------------------------------------------------------------------------------------
# in-kernel math
# ---------------------------------------------------------------------------------------------

def _softmax_lastdim(logits):
    """Numerically-stable softmax; the divide runs on the EUP via the approximate reciprocal."""
    m = jnp.max(logits, axis=-1, keepdims=True)
    e = jnp.exp(logits - m)
    return e * pl.reciprocal(jnp.sum(e, axis=-1, keepdims=True), approx=True)


def _gcn_per_batch(s, xb, wg, bg, *, adj=None, a_s=None):
    """One batch element of the SCGCN core.

    s: (N, C) soft assignment; xb: (N, F) features; wg: (F, nout); bg: (1, nout) f32 bias.
    Either adj (N, N) is given (coarse adjacency computed here) or a precomputed a_s (C, C).
    Every MXU operand stays in the compute dtype; accumulation is f32.  Returns f32 (N, nout).
    """
    f32 = jnp.float32
    cdt = xb.dtype
    tn = (((0,), (0,)), ((), ()))           # contract dim 0 of both: "S^T @ rhs" w/o transposing S
    xs = jax.lax.dot_general(s, xb, tn, preferred_element_type=f32)             # (C, F)
    if a_s is None:
        adj_s = jnp.dot(adj, s, preferred_element_type=f32)                     # (N, C)
        a_s = jax.lax.dot_general(s, adj_s.astype(cdt), tn,
                                  preferred_element_type=f32).astype(cdt)       # (C, C)
    z = jnp.dot(xs.astype(cdt), wg, preferred_element_type=f32)                 # (C, nout)
    z = jnp.dot(a_s, z.astype(cdt), preferred_element_type=f32) + bg            # (C, nout) f32
    return jnp.dot(s, z.astype(cdt), preferred_element_type=f32)                # (N, nout) f32


def _stage1_body(x_ref, wg, bg, write_y, *, nbatch, adj=None, ws=None, bs=None,
                 s_shared=None, a_s=None):
    """Runs the SCGCN core for `nbatch` batch elements (static unroll, nbatch <= 8 by
    construction).  Calls write_y(b, yb_f32) for each element and returns the per-node BatchNorm
    statistics (sum, sum of squares) accumulated over the (batch, out-feature) axes."""
    ssum = None
    ssq = None
    for b in range(nbatch):
        xb = x_ref[b]                                                    # (N, F), compute dtype
        if s_shared is None:                                             # 'linear': S depends on x
            logits = jnp.dot(xb, ws, preferred_element_type=jnp.float32) + bs
            s = _softmax_lastdim(logits).astype(xb.dtype)                # one consistent cast of S
        else:                                                            # 'attention': hoisted S
            s = s_shared
        yb = _gcn_per_batch(s, xb, wg, bg, adj=adj, a_s=a_s)             # (N, nout) f32
        write_y(b, yb)
        rs = jnp.sum(yb, axis=-1, keepdims=True)                         # (N, 1)
        rq = jnp.sum(yb * yb, axis=-1, keepdims=True)
        ssum = rs if ssum is None else ssum + rs
        ssq = rq if ssq is None else ssq + rq
    return ssum, ssq


def _bn_normalize_inplace(o_ref, ssum, ssq, *, nbatch, nout, eps):
    """BatchNorm1d(N) (training-mode batch statistics, identity affine) applied in place to the
    raw activations already staged in the output block."""
    cnt = jnp.float32(nbatch * nout)
    mean = ssum / cnt
    var = ssq / cnt - mean * mean
    inv = jax.lax.rsqrt(jnp.maximum(var, 0.0) + eps)
    for b in range(nbatch):
        yb = o_ref[b].astype(jnp.float32)
        o_ref[b] = ((yb - mean) * inv).astype(o_ref.dtype)


# ---------------------------------------------------------------------------------------------
# kernels
# ---------------------------------------------------------------------------------------------

def _fused_linear_kernel(x_ref, adj_ref, ws_ref, bs_ref, wg_ref, bg_ref, o_ref, *,
                         nbatch, nout, eps):
    """Whole batch in one step: soft assignment -> pool -> cluster GCN -> un-pool -> BatchNorm."""
    def write(b, yb):
        o_ref[b] = yb.astype(o_ref.dtype)
    ssum, ssq = _stage1_body(x_ref, wg_ref[...], bg_ref[...], write, nbatch=nbatch,
                             adj=adj_ref[...], ws=ws_ref[...], bs=bs_ref[...])
    _bn_normalize_inplace(o_ref, ssum, ssq, nbatch=nbatch, nout=nout, eps=eps)


def _fused_attention_kernel(x_ref, s_ref, as_ref, wg_ref, bg_ref, o_ref, *, nbatch, nout, eps):
    def write(b, yb):
        o_ref[b] = yb.astype(o_ref.dtype)
    ssum, ssq = _stage1_body(x_ref, wg_ref[...], bg_ref[...], write, nbatch=nbatch,
                             s_shared=s_ref[...], a_s=as_ref[...])
    _bn_normalize_inplace(o_ref, ssum, ssq, nbatch=nbatch, nout=nout, eps=eps)


def _stage1_linear_kernel(x_ref, adj_ref, ws_ref, bs_ref, wg_ref, bg_ref,
                          y_ref, sum_ref, sq_ref, *, nbatch):
    """Batch-tiled pre-BN stage; also emits the per-node BN partial sums for this tile."""
    def write(b, yb):
        y_ref[b] = yb.astype(y_ref.dtype)
    ssum, ssq = _stage1_body(x_ref, wg_ref[...], bg_ref[...], write, nbatch=nbatch,
                             adj=adj_ref[...], ws=ws_ref[...], bs=bs_ref[...])
    sum_ref[0] = ssum
    sq_ref[0] = ssq


def _stage1_attention_kernel(x_ref, s_ref, as_ref, wg_ref, bg_ref,
                             y_ref, sum_ref, sq_ref, *, nbatch):
    def write(b, yb):
        y_ref[b] = yb.astype(y_ref.dtype)
    ssum, ssq = _stage1_body(x_ref, wg_ref[...], bg_ref[...], write, nbatch=nbatch,
                             s_shared=s_ref[...], a_s=as_ref[...])
    sum_ref[0] = ssum
    sq_ref[0] = ssq


def _bn_apply_kernel(y_ref, mean_ref, inv_ref, o_ref):
    """Elementwise (y - mean) * invstd on a batch tile; mean / invstd are (1, N, 1) residents."""
    y = y_ref[...].astype(jnp.float32)
    o_ref[...] = ((y - mean_ref[...]) * inv_ref[...]).astype(o_ref.dtype)


# ---------------------------------------------------------------------------------------------
# wrapper
# ---------------------------------------------------------------------------------------------

def scgcn_forward(x, adj, params, *, cluster_meth="linear", compute_dtype=None, eps=1e-5,
                  batch_tile=None, vmem_limit_bytes=32 * 1024 * 1024,
                  batch_core_parallel=False, single_buffer_residents=True):
    """SCGCN forward.  x: (B, N, nfeat), adj: (N, N).  Returns (B, N, nout) float32."""
    B, N, F = x.shape
    assert adj.shape == (N, N)
    wg, bg = params["wg"], params["bg"]
    nout = wg.shape[1]

    cdt = x.dtype if compute_dtype is None else compute_dtype
    xc = x.astype(cdt)
    wgc = wg.astype(cdt)
    bgf = bg.astype(jnp.float32)                 # biases added after f32 accumulation

    if cluster_meth == "linear":
        shared = (adj.astype(cdt), params["ws"].astype(cdt),
                  params["bs"].astype(jnp.float32), wgc, bgf)
        fused_kernel, stage1_kernel = _fused_linear_kernel, _stage1_linear_kernel
    elif cluster_meth == "attention":
        # S and A_s = S^T adj S are batch-invariant: compute them ONCE here instead of per step.
        s = jax.nn.softmax(params["soft_matrix"].astype(jnp.float32), axis=-1)
        adj_s = jnp.dot(adj.astype(jnp.float32), s, precision=jax.lax.Precision.HIGHEST)
        a_s = jnp.dot(s.T, adj_s, precision=jax.lax.Precision.HIGHEST)
        shared = (s.astype(cdt), a_s.astype(cdt), wgc, bgf)
        fused_kernel, stage1_kernel = _fused_attention_kernel, _stage1_attention_kernel
    else:
        raise ValueError(f"unknown cluster_meth {cluster_meth!r}")

    itemsize = jnp.dtype(cdt).itemsize
    resident_bytes = sum(_padded_bytes(a.shape, a.dtype.itemsize) for a in shared) * 2
    if batch_tile is None:
        batch_tile = _choose_batch_tile(B, N, F, nout, itemsize, resident_bytes, vmem_limit_bytes)
    assert B % batch_tile == 0, "batch_tile must divide the batch size"
    ntiles = B // batch_tile

    cparams = dict(vmem_limit_bytes=int(vmem_limit_bytes))

    if ntiles == 1:
        # Fully fused single-step kernel: no intermediate tensor ever touches HBM.
        shared_specs = [pl.BlockSpec(a.shape, _const_map(a.ndim)) for a in shared]
        return pl.pallas_call(
            functools.partial(fused_kernel, nbatch=B, nout=nout, eps=eps),
            out_shape=jax.ShapeDtypeStruct((B, N, nout), jnp.float32),
            grid_spec=pltpu.PrefetchScalarGridSpec(
                num_scalar_prefetch=0, grid=(1,),
                in_specs=[pl.BlockSpec((B, N, F), _const_map(3))] + shared_specs,
                out_specs=pl.BlockSpec((B, N, nout), _const_map(3))),
            compiler_params=pltpu.CompilerParams(dimension_semantics=("arbitrary",), **cparams),
        )(xc, *shared)

    # ----- two-stage, batch-tiled path (large B / N) ---------------------------------------
    if batch_core_parallel:
        # TODO(synk): only useful on multi-TensorCore parts (v7x); leave False on v5e / v6e.
        batch_sem = (pltpu.CORE_PARALLEL,)
    else:
        batch_sem = ("parallel",)

    def run_stage1(use_single_buffer):
        # Residents (adj / weights / S / A_s) have constant index_maps; single-buffering them
        # halves their VMEM footprint (matters for (N, N) adj on v7x's 64 MiB VMEM).
        extra = {"pipeline_mode": pl.Buffered(1)} if use_single_buffer else {}
        shared_specs = [pl.BlockSpec(a.shape, _const_map(a.ndim), **extra) for a in shared]
        return pl.pallas_call(
            functools.partial(stage1_kernel, nbatch=batch_tile),
            out_shape=(jax.ShapeDtypeStruct((B, N, nout), cdt),
                       jax.ShapeDtypeStruct((ntiles, N, 1), jnp.float32),
                       jax.ShapeDtypeStruct((ntiles, N, 1), jnp.float32)),
            grid_spec=pltpu.PrefetchScalarGridSpec(
                num_scalar_prefetch=0, grid=(ntiles,),
                in_specs=[pl.BlockSpec((batch_tile, N, F), lambda t: (t, 0, 0))] + shared_specs,
                out_specs=(pl.BlockSpec((batch_tile, N, nout), lambda t: (t, 0, 0)),
                           pl.BlockSpec((1, N, 1), lambda t: (t, 0, 0)),
                           pl.BlockSpec((1, N, 1), lambda t: (t, 0, 0)))),
            compiler_params=pltpu.CompilerParams(dimension_semantics=batch_sem, **cparams),
        )(xc, *shared)

    if single_buffer_residents:
        try:
            outs = run_stage1(True)
            jax.block_until_ready(outs)
        except Exception:   # pl.Buffered(1) / pipeline_mode unsupported on this jax build
            outs = run_stage1(False)
    else:
        outs = run_stage1(False)
    y, ssum, ssq = outs

    # Tiny cross-tile reduction of the per-node BN statistics (B * nout samples per node).
    cnt = jnp.float32(B * nout)
    mean = jnp.sum(ssum, axis=0) / cnt                               # (N, 1)
    var = jnp.sum(ssq, axis=0) / cnt - mean * mean
    inv = jax.lax.rsqrt(jnp.maximum(var, 0.0) + eps)
    mean3, inv3 = mean[None], inv[None]                              # (1, N, 1) f32 residents

    return pl.pallas_call(
        _bn_apply_kernel,
        out_shape=jax.ShapeDtypeStruct((B, N, nout), jnp.float32),
        grid_spec=pltpu.PrefetchScalarGridSpec(
            num_scalar_prefetch=0, grid=(ntiles,),
            in_specs=[pl.BlockSpec((batch_tile, N, nout), lambda t: (t, 0, 0)),
                      pl.BlockSpec((1, N, 1), _const_map(3)),
                      pl.BlockSpec((1, N, 1), _const_map(3))],
            out_specs=pl.BlockSpec((batch_tile, N, nout), lambda t: (t, 0, 0))),
        compiler_params=pltpu.CompilerParams(dimension_semantics=batch_sem, **cparams),
    )(y, mean3, inv3)


# ---------------------------------------------------------------------------------------------
# parameters / reference
# ---------------------------------------------------------------------------------------------

def make_params(key, nfeat, n_nodes, nout, n_cluster):
    """Deterministic synthetic parameters (Linear weights pre-transposed to [in, out])."""
    k1, k2, k3, k4, k5 = jax.random.split(key, 5)
    s = 1.0 / jnp.sqrt(jnp.float32(nfeat))
    xav = 1.414 * jnp.sqrt(6.0 / (n_nodes + n_cluster))
    return {
        "ws": jax.random.uniform(k1, (nfeat, n_cluster), jnp.float32, -s, s),
        "bs": jax.random.uniform(k2, (1, n_cluster), jnp.float32, -s, s),
        "soft_matrix": jax.random.uniform(k3, (n_nodes, n_cluster), jnp.float32, -xav, xav),
        "wg": jax.random.uniform(k4, (nfeat, nout), jnp.float32, -s, s),
        "bg": jax.random.uniform(k5, (1, nout), jnp.float32, -s, s),
    }


def scgcn_reference(x, adj, params, *, cluster_meth="linear", eps=1e-5):
    """Pure-JAX reference of the same forward pass."""
    B, N, F = x.shape
    with jax.default_matmul_precision("highest"):
        if cluster_meth == "linear":
            S = jax.nn.softmax(jnp.einsum("bnf,fc->bnc", x, params["ws"]) + params["bs"], axis=-1)
        else:
            C = params["soft_matrix"].shape[1]
            S = jnp.broadcast_to(jax.nn.softmax(params["soft_matrix"], axis=-1), (B, N, C))
        xs = jnp.einsum("bnc,bnf->bcf", S, x)                         # S^T x
        adj_s = jnp.einsum("nm,bmd->bnd", adj, S)                     # adj S
        a_s = jnp.einsum("bnc,bnd->bcd", S, adj_s)                    # S^T adj S
        z = jnp.einsum("bcd,bdo->bco", a_s,
                       jnp.einsum("bcf,fo->bco", xs, params["wg"])) + params["bg"]
        y = jnp.einsum("bnc,bco->bno", S, z)
    mean = jnp.mean(y, axis=(0, 2), keepdims=True)
    var = jnp.var(y, axis=(0, 2), keepdims=True)                      # biased, training-mode BN
    return (y - mean) / jnp.sqrt(var + eps)


# ---------------------------------------------------------------------------------------------
# smoke test
# ---------------------------------------------------------------------------------------------

if __name__ == "__main__":
    # Small shapes consistent with the module: batch=2, n_nodes=16, nfeat=32, n_cluster=4, nout=8.
    B, N, F, C, OUT = 2, 16, 32, 4, 8
    key = jax.random.PRNGKey(0)
    key, kx, ka, kp = jax.random.split(key, 4)

    x = jax.random.normal(kx, (B, N, F), jnp.float32)
    adj_raw = jax.random.uniform(ka, (N, N), jnp.float32)
    adj = 0.5 * (adj_raw + adj_raw.T) + jnp.eye(N, dtype=jnp.float32)
    adj = adj / jnp.sum(adj, axis=-1, keepdims=True)                  # row-normalized adjacency
    params = make_params(kp, F, N, OUT, C)

    for meth in ("linear", "attention"):
        ref = scgcn_reference(x, adj, params, cluster_meth=meth)

        # Default: fully fused single-step kernel (whole batch resident in VMEM).
        out = scgcn_forward(x, adj, params, cluster_meth=meth)
        jax.block_until_ready(out)
        assert out.shape == (B, N, OUT)
        err = float(jnp.max(jnp.abs(out - ref)))
        assert jnp.allclose(out, ref, atol=3e-2, rtol=3e-2), f"{meth} fused: max abs err {err}"

        # Batch-tiled two-stage path (what large B / N would use): force batch_tile=1.
        out2 = scgcn_forward(x, adj, params, cluster_meth=meth, batch_tile=1)
        jax.block_until_ready(out2)
        err2 = float(jnp.max(jnp.abs(out2 - ref)))
        assert jnp.allclose(out2, ref, atol=3e-2, rtol=3e-2), f"{meth} tiled: max abs err {err2}"

    # bf16-at-the-MXU variant (halves HBM traffic, bf16 MXU passes, f32 accumulation): smoke run.
    out_bf16 = scgcn_forward(x, adj, params, cluster_meth="linear", compute_dtype=jnp.bfloat16)
    jax.block_until_ready(out_bf16)
    assert out_bf16.shape == (B, N, OUT)
    assert bool(jnp.all(jnp.isfinite(out_bf16)))

    print("KERNEL_OK")
</pallas_src>

<mosaic_0001>
module attributes {stable_mosaic.version = 11 : i64} {
  func.func @_fused_linear_kernel(%arg0: i32, %arg1: memref<2x16x32xf32, #tpu.memory_space<vmem>>, %arg2: memref<16x16xf32, #tpu.memory_space<vmem>>, %arg3: memref<32x4xf32, #tpu.memory_space<vmem>>, %arg4: memref<1x4xf32, #tpu.memory_space<vmem>>, %arg5: memref<32x8xf32, #tpu.memory_space<vmem>>, %arg6: memref<1x8xf32, #tpu.memory_space<vmem>>, %arg7: memref<2x16x8xf32, #tpu.memory_space<vmem>>) attributes {dimension_semantics = [#tpu.dimension_semantics<arbitrary>], iteration_bounds = array<i64: 1>, scalar_prefetch = 0 : i64, scratch_operands = 0 : i64, tpu.core_type = #tpu.core_type<tc>, window_params = [{pipeline_mode = #tpu.pipeline_mode<synchronous>, transform_indices = @transform_0, window_bounds = array<i64: 2, 16, 32>}, {pipeline_mode = #tpu.pipeline_mode<synchronous>, transform_indices = @transform_1, window_bounds = array<i64: 16, 16>}, {pipeline_mode = #tpu.pipeline_mode<synchronous>, transform_indices = @transform_2, window_bounds = array<i64: 32, 4>}, {pipeline_mode = #tpu.pipeline_mode<synchronous>, transform_indices = @transform_3, window_bounds = array<i64: 1, 4>}, {pipeline_mode = #tpu.pipeline_mode<synchronous>, transform_indices = @transform_4, window_bounds = array<i64: 32, 8>}, {pipeline_mode = #tpu.pipeline_mode<synchronous>, transform_indices = @transform_5, window_bounds = array<i64: 1, 8>}, {pipeline_mode = #tpu.pipeline_mode<synchronous>, transform_indices = @transform_6, window_bounds = array<i64: 2, 16, 8>}]} {
    %c0 = arith.constant 0 : index
    %c0_0 = arith.constant 0 : index
    %0 = vector.load %arg5[%c0, %c0_0] : memref<32x8xf32, #tpu.memory_space<vmem>>, vector<32x8xf32>
    %c0_1 = arith.constant 0 : index
    %c0_2 = arith.constant 0 : index
    %1 = vector.load %arg6[%c0_1, %c0_2] : memref<1x8xf32, #tpu.memory_space<vmem>>, vector<1x8xf32>
    %c0_3 = arith.constant 0 : index
    %c0_4 = arith.constant 0 : index
    %2 = vector.load %arg2[%c0_3, %c0_4] : memref<16x16xf32, #tpu.memory_space<vmem>>, vector<16x16xf32>
    %c0_5 = arith.constant 0 : index
    %c0_6 = arith.constant 0 : index
    %3 = vector.load %arg3[%c0_5, %c0_6] : memref<32x4xf32, #tpu.memory_space<vmem>>, vector<32x4xf32>
    %c0_7 = arith.constant 0 : index
    %c0_8 = arith.constant 0 : index
    %4 = vector.load %arg4[%c0_7, %c0_8] : memref<1x4xf32, #tpu.memory_space<vmem>>, vector<1x4xf32>
    %c0_9 = arith.constant 0 : index
    %c0_10 = arith.constant 0 : index
    %c0_11 = arith.constant 0 : index
    %5 = vector.load %arg1[%c0_9, %c0_10, %c0_11] : memref<2x16x32xf32, #tpu.memory_space<vmem>>, vector<1x16x32xf32>
    %6 = vector.shape_cast %5 : vector<1x16x32xf32> to vector<16x32xf32>
    %cst = arith.constant dense<0.000000e+00> : vector<16x4xf32>
    %7 = tpu.matmul %6, %3, %cst {dimension_numbers = #tpu.dot_dimension_numbers<[1], [0], [0], [1], [0, 0, 1, 1], [], []>} : vector<16x32xf32>, vector<32x4xf32>, vector<16x4xf32> -> vector<16x4xf32>
    %8 = vector.broadcast %4 : vector<1x4xf32> to vector<16x4xf32>
    %9 = arith.addf %7, %8 : vector<16x4xf32>
    %cst_12 = arith.constant dense<0xFF800000> : vector<16xf32>
    %10 = vector.multi_reduction <maximumf>, %9, %cst_12 [1] : vector<16x4xf32> to vector<16xf32>
    %11 = vector.shape_cast %10 : vector<16xf32> to vector<16x1xf32>
    %12 = vector.broadcast %11 : vector<16x1xf32> to vector<16x4xf32>
    %13 = arith.subf %9, %12 : vector<16x4xf32>
    %14 = math.exp %13 : vector<16x4xf32>
    %cst_13 = arith.constant dense<0.000000e+00> : vector<16xf32>
    %15 = vector.multi_reduction <add>, %14, %cst_13 [1] : vector<16x4xf32> to vector<16xf32>
    %16 = vector.shape_cast %15 : vector<16xf32> to vector<16x1xf32>
    %17 = tpu.reciprocal %16 {approx = true} : vector<16x1xf32> -> vector<16x1xf32>
    %18 = vector.broadcast %17 : vector<16x1xf32> to vector<16x4xf32>
    %19 = arith.mulf %14, %18 : vector<16x4xf32>
    %cst_14 = arith.constant dense<0.000000e+00> : vector<4x32xf32>
    %20 = tpu.matmul %19, %6, %cst_14 {dimension_numbers = #tpu.dot_dimension_numbers<[0], [0], [1], [1], [0, 1, 1, 1], [], []>} : vector<16x4xf32>, vector<16x32xf32>, vector<4x32xf32> -> vector<4x32xf32>
    %cst_15 = arith.constant dense<0.000000e+00> : vector<16x4xf32>
    %21 = tpu.matmul %2, %19, %cst_15 {dimension_numbers = #tpu.dot_dimension_numbers<[1], [0], [0], [1], [0, 0, 1, 1], [], []>} : vector<16x16xf32>, vector<16x4xf32>, vector<16x4xf32> -> vector<16x4xf32>
    %cst_16 = arith.constant dense<0.000000e+00> : vector<4x4xf32>
    %22 = tpu.matmul %19, %21, %cst_16 {dimension_numbers = #tpu.dot_dimension_numbers<[0], [0], [1], [1], [0, 1, 1, 1], [], []>} : vector<16x4xf32>, vector<16x4xf32>, vector<4x4xf32> -> vector<4x4xf32>
    %cst_17 = arith.constant dense<0.000000e+00> : vector<4x8xf32>
    %23 = tpu.matmul %20, %0, %cst_17 {dimension_numbers = #tpu.dot_dimension_numbers<[1], [0], [0], [1], [0, 0, 1, 1], [], []>} : vector<4x32xf32>, vector<32x8xf32>, vector<4x8xf32> -> vector<4x8xf32>
    %cst_18 = arith.constant dense<0.000000e+00> : vector<4x8xf32>
    %24 = tpu.matmul %22, %23, %cst_18 {dimension_numbers = #tpu.dot_dimension_numbers<[1], [0], [0], [1], [0, 0, 1, 1], [], []>} : vector<4x4xf32>, vector<4x8xf32>, vector<4x8xf32> -> vector<4x8xf32>
    %25 = vector.broadcast %1 : vector<1x8xf32> to vector<4x8xf32>
    %26 = arith.addf %24, %25 : vector<4x8xf32>
    %cst_19 = arith.constant dense<0.000000e+00> : vector<16x8xf32>
    %27 = tpu.matmul %19, %26, %cst_19 {dimension_numbers = #tpu.dot_dimension_numbers<[1], [0], [0], [1], [0, 0, 1, 1], [], []>} : vector<16x4xf32>, vector<4x8xf32>, vector<16x8xf32> -> vector<16x8xf32>
    %c0_20 = arith.constant 0 : index
    %c0_21 = arith.constant 0 : index
    %c0_22 = arith.constant 0 : index
    %28 = vector.load %arg7[%c0_20, %c0_21, %c0_22] : memref<2x16x8xf32, #tpu.memory_space<vmem>>, vector<1x16x8xf32>
    %29 = vector.shape_cast %28 : vector<1x16x8xf32> to vector<16x8xf32>
    %30 = vector.shape_cast %27 : vector<16x8xf32> to vector<1x16x8xf32>
    tpu.vector_store %arg7[%c0_20, %c0_21, %c0_22], %30 {strides = array<i32>} : memref<2x16x8xf32, #tpu.memory_space<vmem>>, vector<1x16x8xf32>,
    %cst_23 = arith.constant dense<0.000000e+00> : vector<16xf32>
    %31 = vector.multi_reduction <add>, %27, %cst_23 [1] : vector<16x8xf32> to vector<16xf32>
    %32 = vector.shape_cast %31 : vector<16xf32> to vector<16x1xf32>
    %33 = arith.mulf %27, %27 : vector<16x8xf32>
    %cst_24 = arith.constant dense<0.000000e+00> : vector<16xf32>
    %34 = vector.multi_reduction <add>, %33, %cst_24 [1] : vector<16x8xf32> to vector<16xf32>
    %35 = vector.shape_cast %34 : vector<16xf32> to vector<16x1xf32>
    %c1 = arith.constant 1 : index
    %c0_25 = arith.constant 0 : index
    %c0_26 = arith.constant 0 : index
    %36 = vector.load %arg1[%c1, %c0_25, %c0_26] : memref<2x16x32xf32, #tpu.memory_space<vmem>>, vector<1x16x32xf32>
    %37 = vector.shape_cast %36 : vector<1x16x32xf32> to vector<16x32xf32>
    %cst_27 = arith.constant dense<0.000000e+00> : vector<16x4xf32>
    %38 = tpu.matmul %37, %3, %cst_27 {dimension_numbers = #tpu.dot_dimension_numbers<[1], [0], [0], [1], [0, 0, 1, 1], [], []>} : vector<16x32xf32>, vector<32x4xf32>, vector<16x4xf32> -> vector<16x4xf32>
    %39 = vector.broadcast %4 : vector<1x4xf32> to vector<16x4xf32>
    %40 = arith.addf %38, %39 : vector<16x4xf32>
    %cst_28 = arith.constant dense<0xFF800000> : vector<16xf32>
    %41 = vector.multi_reduction <maximumf>, %40, %cst_28 [1] : vector<16x4xf32> to vector<16xf32>
    %42 = vector.shape_cast %41 : vector<16xf32> to vector<16x1xf32>
    %43 = vector.broadcast %42 : vector<16x1xf32> to vector<16x4xf32>
    %44 = arith.subf %40, %43 : vector<16x4xf32>
    %45 = math.exp %44 : vector<16x4xf32>
    %cst_29 = arith.constant dense<0.000000e+00> : vector<16xf32>
    %46 = vector.multi_reduction <add>, %45, %cst_29 [1] : vector<16x4xf32> to vector<16xf32>
    %47 = vector.shape_cast %46 : vector<16xf32> to vector<16x1xf32>
    %48 = tpu.reciprocal %47 {approx = true} : vector<16x1xf32> -> vector<16x1xf32>
    %49 = vector.broadcast %48 : vector<16x1xf32> to vector<16x4xf32>
    %50 = arith.mulf %45, %49 : vector<16x4xf32>
    %cst_30 = arith.constant dense<0.000000e+00> : vector<4x32xf32>
    %51 = tpu.matmul %50, %37, %cst_30 {dimension_numbers = #tpu.dot_dimension_numbers<[0], [0], [1], [1], [0, 1, 1, 1], [], []>} : vector<16x4xf32>, vector<16x32xf32>, vector<4x32xf32> -> vector<4x32xf32>
    %cst_31 = arith.constant dense<0.000000e+00> : vector<16x4xf32>
    %52 = tpu.matmul %2, %50, %cst_31 {dimension_numbers = #tpu.dot_dimension_numbers<[1], [0], [0], [1], [0, 0, 1, 1], [], []>} : vector<16x16xf32>, vector<16x4xf32>, vector<16x4xf32> -> vector<16x4xf32>
    %cst_32 = arith.constant dense<0.000000e+00> : vector<4x4xf32>
    %53 = tpu.matmul %50, %52, %cst_32 {dimension_numbers = #tpu.dot_dimension_numbers<[0], [0], [1], [1], [0, 1, 1, 1], [], []>} : vector<16x4xf32>, vector<16x4xf32>, vector<4x4xf32> -> vector<4x4xf32>
    %cst_33 = arith.constant dense<0.000000e+00> : vector<4x8xf32>
    %54 = tpu.matmul %51, %0, %cst_33 {dimension_numbers = #tpu.dot_dimension_numbers<[1], [0], [0], [1], [0, 0, 1, 1], [], []>} : vector<4x32xf32>, vector<32x8xf32>, vector<4x8xf32> -> vector<4x8xf32>
    %cst_34 = arith.constant dense<0.000000e+00> : vector<4x8xf32>
    %55 = tpu.matmul %53, %54, %cst_34 {dimension_numbers = #tpu.dot_dimension_numbers<[1], [0], [0], [1], [0, 0, 1, 1], [], []>} : vector<4x4xf32>, vector<4x8xf32>, vector<4x8xf32> -> vector<4x8xf32>
    %56 = vector.broadcast %1 : vector<1x8xf32> to vector<4x8xf32>
    %57 = arith.addf %55, %56 : vector<4x8xf32>
    %cst_35 = arith.constant dense<0.000000e+00> : vector<16x8xf32>
    %58 = tpu.matmul %50, %57, %cst_35 {dimension_numbers = #tpu.dot_dimension_numbers<[1], [0], [0], [1], [0, 0, 1, 1], [], []>} : vector<16x4xf32>, vector<4x8xf32>, vector<16x8xf32> -> vector<16x8xf32>
    %c1_36 = arith.constant 1 : index
    %c0_37 = arith.constant 0 : index
    %c0_38 = arith.constant 0 : index
    %59 = vector.load %arg7[%c1_36, %c0_37, %c0_38] : memref<2x16x8xf32, #tpu.memory_space<vmem>>, vector<1x16x8xf32>
    %60 = vector.shape_cast %59 : vector<1x16x8xf32> to vector<16x8xf32>
    %61 = vector.shape_cast %58 : vector<16x8xf32> to vector<1x16x8xf32>
    tpu.vector_store %arg7[%c1_36, %c0_37, %c0_38], %61 {strides = array<i32>} : memref<2x16x8xf32, #tpu.memory_space<vmem>>, vector<1x16x8xf32>,
    %cst_39 = arith.constant dense<0.000000e+00> : vector<16xf32>
    %62 = vector.multi_reduction <add>, %58, %cst_39 [1] : vector<16x8xf32> to vector<16xf32>
    %63 = vector.shape_cast %62 : vector<16xf32> to vector<16x1xf32>
    %64 = arith.mulf %58, %58 : vector<16x8xf32>
    %cst_40 = arith.constant dense<0.000000e+00> : vector<16xf32>
    %65 = vector.multi_reduction <add>, %64, %cst_40 [1] : vector<16x8xf32> to vector<16xf32>
    %66 = vector.shape_cast %65 : vector<16xf32> to vector<16x1xf32>
    %67 = arith.addf %32, %63 : vector<16x1xf32>
    %68 = arith.addf %35, %66 : vector<16x1xf32>
    %cst_41 = arith.constant 1.600000e+01 : f32
    %69 = vector.broadcast %cst_41 : f32 to vector<16x1xf32>
    %70 = arith.divf %67, %69 : vector<16x1xf32>
    %cst_42 = arith.constant 1.600000e+01 : f32
    %71 = vector.broadcast %cst_42 : f32 to vector<16x1xf32>
    %72 = arith.divf %68, %71 : vector<16x1xf32>
    %73 = arith.mulf %70, %70 : vector<16x1xf32>
    %74 = arith.subf %72, %73 : vector<16x1xf32>
    %cst_43 = arith.constant 0.000000e+00 : f32
    %75 = vector.broadcast %cst_43 : f32 to vector<16x1xf32>
    %76 = arith.maximumf %74, %75 : vector<16x1xf32>
    %cst_44 = arith.constant 9.99999974E-6 : f32
    %77 = vector.broadcast %cst_44 : f32 to vector<16x1xf32>
    %78 = arith.addf %76, %77 : vector<16x1xf32>
    %79 = math.rsqrt %78 : vector<16x1xf32>
    %c0_45 = arith.constant 0 : index
    %c0_46 = arith.constant 0 : index
    %c0_47 = arith.constant 0 : index
    %80 = vector.load %arg7[%c0_45, %c0_46, %c0_47] : memref<2x16x8xf32, #tpu.memory_space<vmem>>, vector<1x16x8xf32>
    %81 = vector.shape_cast %80 : vector<1x16x8xf32> to vector<16x8xf32>
    %82 = vector.broadcast %70 : vector<16x1xf32> to vector<16x8xf32>
    %83 = arith.subf %81, %82 : vector<16x8xf32>
    %84 = vector.broadcast %79 : vector<16x1xf32> to vector<16x8xf32>
    %85 = arith.mulf %83, %84 : vector<16x8xf32>
    %c0_48 = arith.constant 0 : index
    %c0_49 = arith.constant 0 : index
    %c0_50 = arith.constant 0 : index
    %86 = vector.load %arg7[%c0_48, %c0_49, %c0_50] : memref<2x16x8xf32, #tpu.memory_space<vmem>>, vector<1x16x8xf32>
    %87 = vector.shape_cast %86 : vector<1x16x8xf32> to vector<16x8xf32>
    %88 = vector.shape_cast %85 : vector<16x8xf32> to vector<1x16x8xf32>
    tpu.vector_store %arg7[%c0_48, %c0_49, %c0_50], %88 {strides = array<i32>} : memref<2x16x8xf32, #tpu.memory_space<vmem>>, vector<1x16x8xf32>,
    %c1_51 = arith.constant 1 : index
    %c0_52 = arith.constant 0 : index
    %c0_53 = arith.constant 0 : index
    %89 = vector.load %arg7[%c1_51, %c0_52, %c0_53] : memref<2x16x8xf32, #tpu.memory_space<vmem>>, vector<1x16x8xf32>
    %90 = vector.shape_cast %89 : vector<1x16x8xf32> to vector<16x8xf32>
    %91 = vector.broadcast %70 : vector<16x1xf32> to vector<16x8xf32>
    %92 = arith.subf %90, %91 : vector<16x8xf32>
    %93 = vector.broadcast %79 : vector<16x1xf32> to vector<16x8xf32>
    %94 = arith.mulf %92, %93 : vector<16x8xf32>
    %c1_54 = arith.constant 1 : index
    %c0_55 = arith.constant 0 : index
    %c0_56 = arith.constant 0 : index
    %95 = vector.load %arg7[%c1_54, %c0_55, %c0_56] : memref<2x16x8xf32, #tpu.memory_space<vmem>>, vector<1x16x8xf32>
    %96 = vector.shape_cast %95 : vector<1x16x8xf32> to vector<16x8xf32>
    %97 = vector.shape_cast %94 : vector<16x8xf32> to vector<1x16x8xf32>
    tpu.vector_store %arg7[%c1_54, %c0_55, %c0_56], %97 {strides = array<i32>} : memref<2x16x8xf32, #tpu.memory_space<vmem>>, vector<1x16x8xf32>,
    return
  }
  func.func @transform_0(%arg0: i32) -> (i32, i32, i32) {
    %c0_i32 = arith.constant 0 : i32
    %c0_i32_0 = arith.constant 0 : i32
    %c0_i32_1 = arith.constant 0 : i32
    %c0_i32_2 = arith.constant 0 : i32
    return %c0_i32, %c0_i32_0, %c0_i32_1 : i32, i32, i32
  }
  func.func @transform_1(%arg0: i32) -> (i32, i32) {
    %c0_i32 = arith.constant 0 : i32
    %c0_i32_0 = arith.constant 0 : i32
    %c0_i32_1 = arith.constant 0 : i32
    return %c0_i32, %c0_i32_0 : i32, i32
  }
  func.func @transform_2(%arg0: i32) -> (i32, i32) {
    %c0_i32 = arith.constant 0 : i32
    %c0_i32_0 = arith.constant 0 : i32
    %c0_i32_1 = arith.constant 0 : i32
    return %c0_i32, %c0_i32_0 : i32, i32
  }
  func.func @transform_3(%arg0: i32) -> (i32, i32) {
    %c0_i32 = arith.constant 0 : i32
    %c0_i32_0 = arith.constant 0 : i32
    %c0_i32_1 = arith.constant 0 : i32
    return %c0_i32, %c0_i32_0 : i32, i32
  }
  func.func @transform_4(%arg0: i32) -> (i32, i32) {
    %c0_i32 = arith.constant 0 : i32
    %c0_i32_0 = arith.constant 0 : i32
    %c0_i32_1 = arith.constant 0 : i32
    return %c0_i32, %c0_i32_0 : i32, i32
  }
  func.func @transform_5(%arg0: i32) -> (i32, i32) {
    %c0_i32 = arith.constant 0 : i32
    %c0_i32_0 = arith.constant 0 : i32
    %c0_i32_1 = arith.constant 0 : i32
    return %c0_i32, %c0_i32_0 : i32, i32
  }
  func.func @transform_6(%arg0: i32) -> (i32, i32, i32) {
    %c0_i32 = arith.constant 0 : i32
    %c0_i32_0 = arith.constant 0 : i32
    %c0_i32_1 = arith.constant 0 : i32
    %c0_i32_2 = arith.constant 0 : i32
    return %c0_i32, %c0_i32_0, %c0_i32_1 : i32, i32, i32
  }
}

</mosaic_0001>

<bundles_post_ra>
// kernel: tpu_custom_call.1
= control target key start
LH: loop header
LB: loop body
LE: loop exit
PB: predicated region body
PF: predicated region fallthrough
CT: control target
= control target key end

     0   :  { %vm43_vm0 = vcmask 261120   ;;  %vm125_vm1 = vcmask 31744   ;;  %v1521_v23 = vmov 0.0   ;;  %vm1522_vm2 = vmmov 0   ;;  %s1800_s2 = inlined_call_operand.vmem [shape: f32[32,4], index: 2, kind: input, shape index: {}]   ;;  %s1801_s0 = inlined_call_operand.vmem [shape: f32[2,16,32], index: 0, kind: input, shape index: {}]   ;;  %s1802_s3 = inlined_call_operand.vmem [shape: f32[1,4], index: 3, kind: input, shape index: {}]   ;;  %s1803_s1 = inlined_call_operand.vmem [shape: f32[16,16], index: 1, kind: input, shape index: {}]   ;;  %s1804_s4 = inlined_call_operand.vmem [shape: f32[32,8], index: 4, kind: input, shape index: {}]   ;;  %s1805_s5 = inlined_call_operand.vmem [shape: f32[1,8], index: 5, kind: input, shape index: {}]   ;;  %s1806_s6 = inlined_call_operand.vmem [shape: f32[2,16,8], index: 6, kind: output, shape index: {}]  }
   0x1   :  { %v1561_v0 = vld [vmem:[%s1800_s2 + $0x18] sm:$0xff]  ;;  %v1566_v1 = vld [vmem:[%s1800_s2 + $0x10] sm:$0xff]  ;;  %v35_v2 = vld [vmem:[%s1801_s0] sm:$0xff]  ;;  %1404 = vmatprep.subr.mxu1 %v1521_v23  ;;  %1408 = vmatprep.mubr.msk.f32.mxu1 %vm1522_vm2, %v1521_v23  ;;  %vm180_vm3 = vcmask 130048   ;;  %vm487_vm4 = vcmask 1043456   ;;  %vm645_vm5 = vcmask 64512  }
   0x2   :  { %1393 = vmatprep.subr.mxu0 %v1561_v0  ;;  %v1576_v3 = vld [vmem:[%s1800_s2 + $0x8] sm:$0xff]  ;;  %1401 = vmatprep.mubr.msk.f32.mxu0 %vm43_vm0, %v35_v2  ;;  %v1584_v4 = vld [vmem:[%s1800_s2] sm:$0xff]  ;;  %v1637_v33 = vld [vmem:[%s1804_s4 + $0x18] sm:$0xff] }
   0x3   :  { %1394 = vmatpush3.msra.mxu0 %v1561_v0  ;;  %v36_v5 = vld [vmem:[%s1801_s0 + $0x8] sm:$0xff]  ;;  %v1597_v7 = vld [vmem:[%s1802_s3] ss:$0 sm:$0xff]  ;;  %v1646_v34 = vld [vmem:[%s1804_s4 + $0x10] sm:$0xff] }
   0x4   :  { %1395 = vmatprep.subr.mxu0 %v1566_v1  ;;  %1405 = vmatpush3.msra.mxu1 %v36_v5  ;;  %v1622_v30 = vld [vmem:[%s1803_s1] sm:$0xff]  ;;  %v1629_v32 = vld [vmem:[%s1803_s1 + $0x8] sm:$0xff]  ;;  %v1671_v37 = vld [vmem:[%s1801_s0 + $0x10] sm:$0xff] }
   0x5   :  { %1396 = vmatpush3.msra.mxu0 %v1566_v1  ;;  %1406 = vmatprep.subr.mxu1 %v1521_v23  ;;  %v1655_v35 = vld [vmem:[%s1804_s4 + $0x8] sm:$0xff]  ;;  %v1662_v36 = vld [vmem:[%s1804_s4] sm:$0xff]  ;;  %v1322_v42 = vld [vmem:[%s1801_s0 + $0x18] sm:$0xff] }
   0x6   :  { %1397 = vmatprep.subr.mxu0 %v1576_v3  ;;  %1407 = vmatpush3.msra.mxu1 %v35_v2  ;;  %v1708_v63 = vld [vmem:[%s1805_s5] ss:$0 sm:$0xff] }
   0x7   :  { %1398 = vmatpush3.msra.mxu0 %v1576_v3 }
   0x8   :  { %1399 = vmatprep.subr.mxu0 %v1584_v4 }
   0x9   :  { %1400 = vmatpush3.msra.mxu0 %v1584_v4 }
   0xa   :  { %1402 = vmatmul.mubr.msk.f32.vlgmr.msra.gmra.mxu0 %vm43_vm0, %v36_v5  ;;  %1418 = vmatprep.subr.mxu0 %v1521_v23 }
   0xb   :  { %1422 = vmatprep.mubr.msk.f32.mxu0 %vm1522_vm2, %v1521_v23 }
  0xca   :  { %v1403_v6 = vpop.f32.mrf.mxu0 }
  0xcb   :  { %v122_v10 = vadd.f32 %v1403_v6, %v1597_v7 }
  0xcc   :  { %v116_v8 = vpop.f32.mrf.mxu0 }
  0xcd   :  { %v117_v9 = vadd.f32 %v1597_v7, %v116_v8  ;;  %v129_v12 = vsel %vm125_vm1, %v122_v10, -inf }
  0xcf   :  { %v126_v11 = vsel %vm125_vm1, %v117_v9, -inf }
  0xd0   :  { %127 = vmax.xlane.f32.xlu0 %v126_v11 }
  0xd4   :  { %130 = vmax.xlane.f32.xlu0 %v129_v12 }
 0x159   :  { %v128_v13 = vpop.xlane.xlu0 %127 }
 0x15a   :  { %v132_v14 = vsub.f32 %v117_v9, %v128_v13 }
 0x15c   :  { %v134_v15 = vmul.f32 1.442695, %v132_v14 }
 0x15d   :  { %v131_v16 = vpop.xlane.xlu0 %130 }
 0x15e   :  { %1501 = vpow2.f32 %v134_v15  ;;  %v133_v17 = vsub.f32 %v122_v10, %v131_v16 }
 0x160   :  { %v136_v18 = vmul.f32 1.442695, %v133_v17 }
 0x162   :  { %1503 = vpow2.f32 %v136_v18 }
 0x16b   :  { %v1502_v19 = vpop.eup %1501 }
 0x16c   :  { %v138_v20 = vsel %vm125_vm1, %v1502_v19, 0.0 }
 0x16d   :  { %139 = vadd.xlane.f32.xlu1 %v138_v20 }
 0x16f   :  { %v1504_v21 = vpop.eup %1503 }
 0x170   :  { %v141_v22 = vsel %vm125_vm1, %v1504_v21, 0.0 }
 0x171   :  { %142 = vadd.xlane.f32.xlu1 %v141_v22 }
 0x1f6   :  { %v140_v24 = vpop.xlane.xlu1 %139 }
 0x1f7   :  { %1505 = vrcp.f32 %v140_v24 }
 0x1fa   :  { %v143_v25 = vpop.xlane.xlu1 %142 }
 0x1fb   :  { %1507 = vrcp.f32 %v143_v25 }
 0x204   :  { %v1506_v26 = vpop.eup %1505 }
 0x205   :  { %v1612_v27 = vmul.f32 %v1506_v26, %v1502_v19 }
 0x207   :  { %148 = vxpose.xlu0.b32.start [1/2] (short) (narrow) %v1612_v27, 8 }
 0x208   :  { %v1508_v28 = vpop.eup %1507 }
 0x209   :  { %v1615_v29 = vmul.f32 %v1508_v28, %v1504_v21 }
 0x20b   :  { %149 = vxpose.xlu0.b32.end [2/2] (short) (narrow) %v1615_v29, 8  ;;  %1411 = vmatprep.subr.mxu1 %v1615_v29 }
 0x283   :  { %v164_v31 = vpop.trf.xlu0 }
 0x284   :  { %1409 = vmatmul.mubr.msk.f32.vlgmr.msra.gmra.mxu1 %vm180_vm3, %v164_v31 }
 0x285   :  { %1412 = vmatpush3.msra.mxu1 %v1615_v29  ;;  %1415 = vmatprep.mubr.msk.f32.mxu1 %vm180_vm3, %v1622_v30 }
 0x286   :  { %1413 = vmatprep.subr.mxu1 %v1612_v27 }
 0x287   :  { %1414 = vmatpush3.msra.mxu1 %v1612_v27 }
 0x288   :  { %1416 = vmatmul.mubr.msk.f32.vlgmr.msra.gmra.mxu1 %vm180_vm3, %v1629_v32  ;;  %1425 = vmatprep.subr.mxu1 %v1521_v23 }
 0x289   :  { %1426 = vmatpush3.msra.mxu1 %v1637_v33  ;;  %1433 = vmatprep.mubr.msk.f32.mxu1 %vm1522_vm2, %v1521_v23 }
 0x28a   :  { %1427 = vmatprep.subr.mxu1 %v1521_v23 }
 0x28b   :  { %1428 = vmatpush3.msra.mxu1 %v1646_v34 }
 0x28c   :  { %1429 = vmatprep.subr.mxu1 %v1521_v23 }
 0x28d   :  { %1430 = vmatpush3.msra.mxu1 %v1655_v35 }
 0x28e   :  { %1431 = vmatprep.subr.mxu1 %v1521_v23 }
 0x28f   :  { %1432 = vmatpush3.msra.mxu1 %v1662_v36 }
 0x290   :  { %1446 = vmatprep.subr.mxu1 %v1561_v0 }
 0x344   :  { %v250_v38 = vpop.f32.mrf.mxu1 }
 0x345   :  { %1434 = vmatmul.mubr.msk.f32.vlgmr.msra.gmra.mxu1 %vm43_vm0, %v250_v38 }
 0x346   :  { %1447 = vmatpush3.msra.mxu1 %v1561_v0  ;;  %v1410_v39 = vpop.f32.mrf.mxu1  ;;  %1454 = vmatprep.mubr.msk.f32.mxu1 %vm43_vm0, %v1671_v37 }
 0x347   :  { %1448 = vmatprep.subr.mxu1 %v1566_v1 }
 0x348   :  { %1449 = vmatpush3.msra.mxu1 %v1566_v1  ;;  %v1417_v40 = vpop.f32.mrf.mxu1 }
 0x349   :  { %1450 = vmatprep.subr.mxu1 %v1576_v3  ;;  %1419 = vmatpush3.msra.mxu0 %v1417_v40 }
 0x34a   :  { %1451 = vmatpush3.msra.mxu1 %v1576_v3  ;;  %v326_v41 = vpop.f32.mrf.mxu1  ;;  %1420 = vmatprep.subr.mxu0 %v1521_v23 }
 0x34b   :  { %1452 = vmatprep.subr.mxu1 %v1584_v4  ;;  %1421 = vmatpush3.msra.mxu0 %v326_v41 }
 0x34c   :  { %1453 = vmatpush3.msra.mxu1 %v1584_v4  ;;  %1423 = vmatmul.mubr.msk.f32.vlgmr.msra.gmra.mxu0 %vm180_vm3, %v164_v31 }
 0x34d   :  { %1455 = vmatmul.mubr.msk.f32.vlgmr.msra.gmra.mxu1 %vm43_vm0, %v1322_v42  ;;  %1436 = vmatprep.subr.mxu0 %v1521_v23 }
 0x34e   :  { %1438 = vmatprep.mubr.msk.f32.mxu0 %vm1522_vm2, %v1521_v23  ;;  %1471 = vmatprep.subr.mxu1 %v1521_v23 }
 0x34f   :  { %1475 = vmatprep.mubr.msk.f32.mxu1 %vm1522_vm2, %v1521_v23 }
 0x405   :  { %v474_v43 = vpop.f32.mrf.mxu1 }
 0x406   :  { %1437 = vmatpush3.msk.msra.mxu0 %vm487_vm4, %v474_v43 }
 0x407   :  { %v1435_v44 = vpop.f32.mrf.mxu1 }
 0x40c   :  { %v401_v45 = vpop.f32.mrf.mxu0 }
 0x40d   :  { %v1456_v46 = vpop.f32.mrf.mxu1  ;;  %1439 = vmatmul.mubr.msk.f32.vlgmr.msra.gmra.mxu0 %vm125_vm1, %v401_v45 }
 0x40e   :  { %v1424_v47 = vpop.f32.mrf.mxu0  ;;  %1443 = vmatprep.mubr.msk.f32.mxu0 %vm125_vm1, %v1612_v27  ;;  %v743_v50 = vadd.f32 %v1456_v46, %v1597_v7 }
 0x40f   :  { %v737_v48 = vpop.f32.mrf.mxu1 }
 0x410   :  { %v738_v49 = vadd.f32 %v1597_v7, %v737_v48  ;;  %v749_v52 = vsel %vm125_vm1, %v743_v50, -inf }
 0x412   :  { %v746_v51 = vsel %vm125_vm1, %v738_v49, -inf }
 0x413   :  { %747 = vmax.xlane.f32.xlu1 %v746_v51 }
 0x417   :  { %750 = vmax.xlane.f32.xlu1 %v749_v52 }
 0x49c   :  { %v748_v53 = vpop.xlane.xlu1 %747 }
 0x49d   :  { %v752_v54 = vsub.f32 %v738_v49, %v748_v53 }
 0x49f   :  { %v754_v55 = vmul.f32 1.442695, %v752_v54 }
 0x4a0   :  { %v751_v56 = vpop.xlane.xlu1 %750 }
 0x4a1   :  { %1509 = vpow2.f32 %v754_v55  ;;  %v753_v57 = vsub.f32 %v743_v50, %v751_v56 }
 0x4a3   :  { %v756_v58 = vmul.f32 1.442695, %v753_v57 }
 0x4a5   :  { %1511 = vpow2.f32 %v756_v58 }
 0x4ae   :  { %v1510_v59 = vpop.eup %1509 }
 0x4af   :  { %v758_v60 = vsel %vm125_vm1, %v1510_v59, 0.0 }
 0x4b0   :  { %759 = vadd.xlane.f32.xlu1 %v758_v60 }
 0x4b2   :  { %v1512_v61 = vpop.eup %1511 }
 0x4b3   :  { %v761_v62 = vsel %vm125_vm1, %v1512_v61, 0.0 }
 0x4b4   :  { %762 = vadd.xlane.f32.xlu1 %v761_v62 }
 0x4cd   :  { %v557_v0 = vpop.f32.mrf.mxu0 }
 0x4ce   :  { %v558_v1 = vadd.f32 %v1708_v63, %v557_v0 }
 0x4cf   :  { %v1440_v2 = vpop.f32.mrf.mxu0 }
 0x4d0   :  { %1441 = vmatprep.subr.msk.mxu0 %vm487_vm4, %v558_v1 }
 0x4d1   :  { %1442 = vmatpush3.msk.msra.mxu0 %vm487_vm4, %v558_v1 }
 0x4d2   :  { %1444 = vmatmul.mubr.msk.f32.vlgmr.msra.gmra.mxu0 %vm125_vm1, %v1615_v29  ;;  %1457 = vmatprep.subr.mxu0 %v1521_v23 }
 0x4d3   :  { %1458 = vmatpush3.msra.mxu0 %v1322_v42  ;;  %1461 = vmatprep.mubr.msk.f32.mxu0 %vm1522_vm2, %v1521_v23 }
 0x4d4   :  { %1459 = vmatprep.subr.mxu0 %v1521_v23 }
 0x4d5   :  { %1460 = vmatpush3.msra.mxu0 %v1671_v37 }
 0x539   :  { %v760_v3 = vpop.xlane.xlu1 %759 }
 0x53a   :  { %1513 = vrcp.f32 %v760_v3 }
 0x53d   :  { %v763_v4 = vpop.xlane.xlu1 %762 }
 0x53e   :  { %1515 = vrcp.f32 %v763_v4 }
 0x547   :  { %v1514_v5 = vpop.eup %1513 }
 0x548   :  { %v766_v6 = vmul.f32 %v1514_v5, %v1510_v59 }
 0x54a   :  { %768 = vxpose.xlu1.b32.start [1/2] (short) (narrow) %v766_v6, 8 }
 0x54b   :  { %v1516_v7 = vpop.eup %1515 }
 0x54c   :  { %v767_v8 = vmul.f32 %v1516_v7, %v1512_v61 }
 0x54e   :  { %769 = vxpose.xlu1.b32.end [2/2] (short) (narrow) %v767_v8, 8  ;;  %1464 = vmatprep.subr.mxu0 %v767_v8 }
 0x592   :  { %v1445_v9 = vpop.f32.mrf.mxu0 }
 0x593   :  { %647 = vst.msk [vmem:[%s1806_s6 + $0x8] sm:$0xff] %vm645_vm5, %v1445_v9  ;;  %v651_v10 = vsel %vm645_vm5, %v1445_v9, 0.0  ;;  %v655_v13 = vmul.f32 %v1445_v9, %v1445_v9 }
 0x594   :  { %652 = vadd.xlane.f32.xlu1 %v651_v10  ;;  %v636_v11 = vpop.f32.mrf.mxu0 }
 0x595   :  { %646 = vst.msk [vmem:[%s1806_s6] sm:$0xff] %vm645_vm5, %v636_v11  ;;  %v648_v12 = vsel %vm645_vm5, %v636_v11, 0.0  ;;  %v659_v14 = vsel %vm645_vm5, %v655_v13, 0.0  ;;  %v654_v15 = vmul.f32 %v636_v11, %v636_v11 }
 0x596   :  { %649 = vadd.xlane.f32.xlu0 %v648_v12 }
 0x597   :  { %v656_v16 = vsel %vm645_vm5, %v654_v15, 0.0 }
 0x59a   :  { %660 = vadd.xlane.f32.xlu0 %v659_v14  ;;  %v1288_v61 = vld [vmem:[%s1806_s6 + $0x8] sm:$0xff] }
 0x59c   :  { %v1287_v5 = vld [vmem:[%s1806_s6] sm:$0xff] }
 0x59e   :  { %657 = vadd.xlane.f32.xlu0 %v656_v16 }
 0x5c6   :  { %v784_v17 = vpop.trf.xlu1 }
 0x5c7   :  { %1462 = vmatmul.mubr.msk.f32.vlgmr.msra.gmra.mxu0 %vm180_vm3, %v784_v17 }
 0x5c8   :  { %1465 = vmatpush3.msra.mxu0 %v767_v8  ;;  %1468 = vmatprep.mubr.msk.f32.mxu0 %vm180_vm3, %v1622_v30 }
 0x5c9   :  { %1466 = vmatprep.subr.mxu0 %v766_v6 }
 0x5ca   :  { %1467 = vmatpush3.msra.mxu0 %v766_v6 }
 0x5cb   :  { %1469 = vmatmul.mubr.msk.f32.vlgmr.msra.gmra.mxu0 %vm180_vm3, %v1629_v32  ;;  %1478 = vmatprep.subr.mxu0 %v1521_v23 }
 0x5cc   :  { %1479 = vmatpush3.msra.mxu0 %v1637_v33  ;;  %1486 = vmatprep.mubr.msk.f32.mxu0 %vm1522_vm2, %v1521_v23 }
 0x5cd   :  { %1480 = vmatprep.subr.mxu0 %v1521_v23 }
 0x5ce   :  { %1481 = vmatpush3.msra.mxu0 %v1646_v34 }
 0x5cf   :  { %1482 = vmatprep.subr.mxu0 %v1521_v23 }
 0x5d0   :  { %1483 = vmatpush3.msra.mxu0 %v1655_v35 }
 0x5d1   :  { %1484 = vmatprep.subr.mxu0 %v1521_v23 }
 0x5d2   :  { %1485 = vmatpush3.msra.mxu0 %v1662_v36 }
 0x61d   :  { %v653_v40 = vpop.xlane.xlu1 %652 }
 0x61f   :  { %v650_v37 = vpop.xlane.xlu0 %649 }
 0x623   :  { %v661_v38 = vpop.xlane.xlu0 %660 }
 0x627   :  { %v658_v39 = vpop.xlane.xlu0 %657 }
 0x687   :  { %v869_v18 = vpop.f32.mrf.mxu0 }
 0x688   :  { %1487 = vmatmul.mubr.msk.f32.vlgmr.msra.gmra.mxu0 %vm43_vm0, %v869_v18 }
 0x689   :  { %v1463_v19 = vpop.f32.mrf.mxu0 }
 0x68b   :  { %v1470_v20 = vpop.f32.mrf.mxu0 }
 0x68c   :  { %1472 = vmatpush3.msra.mxu1 %v1470_v20 }
 0x68d   :  { %v939_v21 = vpop.f32.mrf.mxu0  ;;  %1473 = vmatprep.subr.mxu1 %v1521_v23 }
 0x68e   :  { %1474 = vmatpush3.msra.mxu1 %v939_v21 }
 0x68f   :  { %1476 = vmatmul.mubr.msk.f32.vlgmr.msra.gmra.mxu1 %vm180_vm3, %v784_v17  ;;  %1489 = vmatprep.subr.mxu1 %v1521_v23 }
 0x690   :  { %1491 = vmatprep.mubr.msk.f32.mxu1 %vm1522_vm2, %v1521_v23 }
 0x748   :  { %v1087_v22 = vpop.f32.mrf.mxu0 }
 0x749   :  { %1490 = vmatpush3.msk.msra.mxu1 %vm487_vm4, %v1087_v22 }
 0x74a   :  { %v1488_v24 = vpop.f32.mrf.mxu0 }
 0x74f   :  { %v1014_v25 = vpop.f32.mrf.mxu1 }
 0x750   :  { %1492 = vmatmul.mubr.msk.f32.vlgmr.msra.gmra.mxu1 %vm125_vm1, %v1014_v25 }
 0x751   :  { %v1477_v26 = vpop.f32.mrf.mxu1  ;;  %1496 = vmatprep.mubr.msk.f32.mxu1 %vm125_vm1, %v766_v6 }
 0x810   :  { %v1163_v27 = vpop.f32.mrf.mxu1 }
 0x811   :  { %v1164_v28 = vadd.f32 %v1708_v63, %v1163_v27 }
 0x812   :  { %v1493_v29 = vpop.f32.mrf.mxu1 }
 0x813   :  { %1494 = vmatprep.subr.msk.mxu1 %vm487_vm4, %v1164_v28 }
 0x814   :  { %1495 = vmatpush3.msk.msra.mxu1 %vm487_vm4, %v1164_v28 }
 0x815   :  { %1497 = vmatmul.mubr.msk.f32.vlgmr.msra.gmra.mxu1 %vm125_vm1, %v767_v8 }
 0x8d5   :  { %v1498_v23 = vpop.f32.mrf.mxu1 }
 0x8d6   :  { %1336 = vst.msk [vmem:[%s1806_s6 + $0x18] sm:$0xff] %vm645_vm5, %v1498_v23  ;;  %v1257_v30 = vsel %vm645_vm5, %v1498_v23, 0.0  ;;  %v1261_v31 = vmul.f32 %v1498_v23, %v1498_v23 }
 0x8d7   :  { %v1242_v32 = vpop.f32.mrf.mxu1  ;;  %1258 = vadd.xlane.f32.xlu0 %v1257_v30 }
 0x8d8   :  { %1335 = vst.msk [vmem:[%s1806_s6 + $0x10] sm:$0xff] %vm645_vm5, %v1242_v32  ;;  %v1265_v33 = vsel %vm645_vm5, %v1261_v31, 0.0  ;;  %v1260_v34 = vmul.f32 %v1242_v32, %v1242_v32  ;;  %v1254_v35 = vsel %vm645_vm5, %v1242_v32, 0.0 }
 0x8d9   :  { %1266 = vadd.xlane.f32.xlu1 %v1265_v33 }
 0x8da   :  { %v1262_v36 = vsel %vm645_vm5, %v1260_v34, 0.0 }
 0x8db   :  { %1255 = vadd.xlane.f32.xlu0 %v1254_v35 }
 0x8dd   :  { %v1338_v62 = vld [vmem:[%s1806_s6 + $0x18] sm:$0xff] }
 0x8df   :  { %1263 = vadd.xlane.f32.xlu0 %v1262_v36  ;;  %v1337_v4 = vld [vmem:[%s1806_s6 + $0x10] sm:$0xff] }
 0x960   :  { %v1259_v41 = vpop.xlane.xlu0 %1258 }
 0x961   :  { %v1269_v42 = vadd.f32 %v1259_v41, %v653_v40 }
 0x962   :  { %v1267_v43 = vpop.xlane.xlu1 %1266 }
 0x963   :  { %v1274_v44 = vmul.f32 0.0625, %v1269_v42  ;;  %v1271_v45 = vadd.f32 %v1267_v43, %v661_v38 }
 0x964   :  { %v1256_v46 = vpop.xlane.xlu0 %1255 }
 0x965   :  { %v1276_v47 = vmul.f32 0.0625, %v1271_v45  ;;  %v1278_v48 = vmul.f32 %v1274_v44, %v1274_v44  ;;  %v1268_v49 = vadd.f32 %v1256_v46, %v650_v37  ;;  %v1290_v63 = vsub.f32 %v1288_v61, %v1274_v44 }
 0x966   :  { %v1298_v0 = vsub.f32 %v1338_v62, %v1274_v44 }
 0x967   :  { %v1280_v50 = vsub.f32 %v1276_v47, %v1278_v48  ;;  %v1273_v51 = vmul.f32 0.0625, %v1268_v49 }
 0x968   :  { %v1264_v52 = vpop.xlane.xlu0 %1263 }
 0x969   :  { %v1282_v53 = vmax.f32 %v1280_v50, 0.0  ;;  %v1270_v54 = vadd.f32 %v1264_v52, %v658_v39  ;;  %v1277_v56 = vmul.f32 %v1273_v51, %v1273_v51  ;;  %v1289_v6 = vsub.f32 %v1287_v5, %v1273_v51 }
 0x96a   :  { %v1297_v7 = vsub.f32 %v1337_v4, %v1273_v51 }
 0x96b   :  { %v1284_v55 = vadd.f32 1e-05, %v1282_v53  ;;  %v1275_v57 = vmul.f32 0.0625, %v1270_v54 }
 0x96d   :  { %1517 = vrsqrt.f32 %v1284_v55  ;;  %v1279_v58 = vsub.f32 %v1275_v57, %v1277_v56 }
 0x96f   :  { %v1281_v59 = vmax.f32 %v1279_v58, 0.0 }
 0x971   :  { %v1283_v60 = vadd.f32 1e-05, %v1281_v59 }
 0x973   :  { %1519 = vrsqrt.f32 %v1283_v60 }
 0x97a   :  { %v1518_v1 = vpop.eup %1517 }
 0x97b   :  { %v1292_v2 = vmul.f32 %v1518_v1, %v1290_v63  ;;  %v1300_v3 = vmul.f32 %v1518_v1, %v1298_v0 }
 0x97d   :  { %1294 = vst.msk [vmem:[%s1806_s6 + $0x8] sm:$0xff] %vm645_vm5, %v1292_v2  ;;  %1340 = vst.msk [vmem:[%s1806_s6 + $0x18] sm:$0xff] %vm645_vm5, %v1300_v3 }
 0x980   :  { %v1520_v8 = vpop.eup %1519 }
 0x981   :  { %v1291_v9 = vmul.f32 %v1520_v8, %v1289_v6  ;;  %v1299_v10 = vmul.f32 %v1520_v8, %v1297_v7 }
 0x983   :  { %1293 = vst.msk [vmem:[%s1806_s6] sm:$0xff] %vm645_vm5, %v1291_v9  ;;  %1339 = vst.msk [vmem:[%s1806_s6 + $0x10] sm:$0xff] %vm645_vm5, %v1299_v10 }

</bundles_post_ra>
